<compile_context>
chip_gen: v7x
topology: tpu7x:2x2x1
jax: 0.10.0
libtpu: 0.0.40
codegen_flags: <defaults>
</compile_context>

<pallas_src>
import functools

import jax
import jax.numpy as jnp
import numpy as np
from jax import lax
from jax.experimental import pallas as pl
from jax.experimental.pallas import tpu as pltpu


def _dice_kernel(logits_ref, targets_ref, dice_ref,
                 inter_acc, p_acc, t_acc, *, smooth, valid_cols):
    """Grid = (B, S_pad // TS).  Per step: softmax over C for one spatial tile,
    accumulate intersection / per-channel sums in (C, 1) scratch; on the last
    spatial tile write the per-(batch, channel) dice score."""
    s = pl.program_id(1)

    @pl.when(s == 0)
    def _():
        inter_acc[...] = jnp.zeros_like(inter_acc)
        p_acc[...] = jnp.zeros_like(p_acc)
        t_acc[...] = jnp.zeros_like(t_acc)

    x = logits_ref[0].astype(jnp.float32)    # (C, TS)
    t = targets_ref[0].astype(jnp.float32)   # (C, TS)
    ts = x.shape[1]

    # softmax over the channel axis (axis 0 here == dim=1 in NCHW)
    m = jnp.max(x, axis=0, keepdims=True)              # (1, TS)
    e = jnp.exp(x - m)                                  # (C, TS)
    denom = jnp.sum(e, axis=0, keepdims=True)           # (1, TS)
    inv = pl.reciprocal(denom, approx=False)            # one recip per column
    p = e * inv                                          # (C, TS)

    if valid_cols is not None:
        # Padded columns: targets are zero-padded by the wrapper (so inter and
        # t_acc are already correct), but softmax of a padded column still
        # sums to 1 -> mask p out of p_acc.
        col = lax.broadcasted_iota(jnp.int32, (1, ts), 1) + s * ts
        p = jnp.where(col < valid_cols, p, 0.0)

    # keepdims sums stay in sublane layout -> no per-step relayout.
    inter_acc[...] += jnp.sum(p * t, axis=1, keepdims=True)   # (C, 1)
    p_acc[...] += jnp.sum(p, axis=1, keepdims=True)           # (C, 1)
    t_acc[...] += jnp.sum(t, axis=1, keepdims=True)           # (C, 1)

    @pl.when(s == pl.num_programs(1) - 1)
    def _():
        inter = inter_acc[...]                  # (C, 1)
        union = p_acc[...] + t_acc[...]         # (C, 1)
        dice = (2.0 * inter + smooth) / (union + smooth)
        dice_ref[0, :, :] = dice                # per-batch (1, C, 1) block


def _round_up(x, m):
    return ((x + m - 1) // m) * m


def _choose_spatial_tiling(C, S, in_itemsize_bytes):
    """Pick (TS, S_pad): TS multiple of 128, TS * n_s == S_pad >= S, with
    double-buffered input tiles bounded by a VMEM budget valid on all gens."""
    budget = 16 * 1024 * 1024                       # double-buffered inputs
    bytes_per_col = 2 * C * in_itemsize_bytes       # 2 buffers x C rows x bytes
    ts_cap = max(128, min(8192, (budget // bytes_per_col) // 128 * 128))
    s_pad_min = _round_up(S, 128)
    n_s = -(-s_pad_min // ts_cap)                   # ceil div
    ts = _round_up(-(-s_pad_min // n_s), 128)       # <= ts_cap by construction
    return ts, n_s * ts


def dice_loss(logits, targets, smooth=1e-6):
    """Exact equivalent of DiceLoss.forward for NCHW inputs."""
    B, C = logits.shape[0], logits.shape[1]
    S = int(np.prod(logits.shape[2:]))

    logits_f = logits.reshape(B, C, S)
    targets_f = targets.reshape(B, C, S)

    in_itemsize = logits_f.dtype.itemsize + targets_f.dtype.itemsize
    TS, S_pad = _choose_spatial_tiling(C, S, in_itemsize)
    if S_pad != S:
        pad = S_pad - S
        logits_f = jnp.pad(logits_f, ((0, 0), (0, 0), (0, pad)))
        targets_f = jnp.pad(targets_f, ((0, 0), (0, 0), (0, pad)))
    n_s = S_pad // TS

    kernel = functools.partial(
        _dice_kernel,
        smooth=float(smooth),
        valid_cols=S if S_pad != S else None,
    )

    dice_bc1 = pl.pallas_call(
        kernel,
        out_shape=jax.ShapeDtypeStruct((B, C, 1), jnp.float32),
        grid_spec=pltpu.PrefetchScalarGridSpec(
            num_scalar_prefetch=0,
            grid=(B, n_s),
            in_specs=[
                pl.BlockSpec((1, C, TS), lambda b, s: (b, 0, s)),
                pl.BlockSpec((1, C, TS), lambda b, s: (b, 0, s)),
            ],
            # Per-batch output block so the parallel B axis never races
            # across TensorCores (v7x has 2 TCs).
            out_specs=pl.BlockSpec((1, C, 1), lambda b, s: (b, 0, 0)),
            scratch_shapes=[
                pltpu.VMEM((C, 1), jnp.float32),   # intersection accumulator
                pltpu.VMEM((C, 1), jnp.float32),   # sum of softmax probs
                pltpu.VMEM((C, 1), jnp.float32),   # sum of targets
            ],
        ),
        compiler_params=pltpu.CompilerParams(
            dimension_semantics=("parallel", "arbitrary"),
            vmem_limit_bytes=32 * 1024 * 1024,
        ),
    )(logits_f, targets_f)

    # dice.mean(dim=1) then .mean() == overall mean; 1 - mean is cheap glue.
    return 1.0 - jnp.mean(dice_bc1)


def _dice_loss_ref(logits, targets, smooth=1e-6):
    """Pure-JAX reference mirroring the PyTorch code, for a sanity check."""
    B, C = logits.shape[0], logits.shape[1]
    p = jax.nn.softmax(logits.astype(jnp.float32), axis=1).reshape(B, C, -1)
    t = targets.astype(jnp.float32).reshape(B, C, -1)
    inter = jnp.sum(p * t, axis=2)
    union = jnp.sum(p, axis=2) + jnp.sum(t, axis=2)
    dice = (2.0 * inter + smooth) / (union + smooth)
    return 1.0 - jnp.mean(jnp.mean(dice, axis=1))


if __name__ == "__main__":
    key = jax.random.PRNGKey(0)
    k1, k2, k3, k4 = jax.random.split(key, 4)

    # Case 1: S is a multiple of 128 (16*16 = 256) -> no-padding path.
    B, C, H, W = 2, 4, 16, 16
    logits = jax.random.normal(k1, (B, C, H, W), dtype=jnp.float32)
    labels = jax.random.randint(k2, (B, H, W), 0, C)
    targets = jax.nn.one_hot(labels, C, axis=1, dtype=jnp.float32)  # (B, C, H, W)

    loss = jax.block_until_ready(dice_loss(logits, targets))
    ref = _dice_loss_ref(logits, targets)
    np.testing.assert_allclose(np.asarray(loss), np.asarray(ref),
                               rtol=1e-5, atol=1e-6)

    # Case 2: S NOT a multiple of 128 (10*10 = 100) -> padding + mask path.
    B2, C2, H2, W2 = 2, 4, 10, 10
    logits2 = jax.random.normal(k3, (B2, C2, H2, W2), dtype=jnp.float32)
    labels2 = jax.random.randint(k4, (B2, H2, W2), 0, C2)
    targets2 = jax.nn.one_hot(labels2, C2, axis=1, dtype=jnp.float32)

    loss2 = jax.block_until_ready(dice_loss(logits2, targets2))
    ref2 = _dice_loss_ref(logits2, targets2)
    np.testing.assert_allclose(np.asarray(loss2), np.asarray(ref2),
                               rtol=1e-5, atol=1e-6)

    print("KERNEL_OK")
</pallas_src>

<mosaic_0001>
module attributes {stable_mosaic.version = 11 : i64} {
  func.func @_dice_kernel(%arg0: i32, %arg1: i32, %arg2: memref<1x4x256xf32, #tpu.memory_space<vmem>>, %arg3: memref<1x4x256xf32, #tpu.memory_space<vmem>>, %arg4: memref<1x4x1xf32, #tpu.memory_space<vmem>>, %arg5: memref<4x1xf32, #tpu.memory_space<vmem>>, %arg6: memref<4x1xf32, #tpu.memory_space<vmem>>, %arg7: memref<4x1xf32, #tpu.memory_space<vmem>>) attributes {dimension_semantics = [#tpu.dimension_semantics<parallel>, #tpu.dimension_semantics<arbitrary>], iteration_bounds = array<i64: 2, 1>, scalar_prefetch = 0 : i64, scratch_operands = 3 : i64, tpu.core_type = #tpu.core_type<tc>, window_params = [{transform_indices = @transform_0, window_bounds = array<i64: 1, 4, 256>}, {transform_indices = @transform_1, window_bounds = array<i64: 1, 4, 256>}, {transform_indices = @transform_2, window_bounds = array<i64: 1, 4, 1>}]} {
    %c0_i32 = arith.constant 0 : i32
    %0 = arith.cmpi eq, %arg1, %c0_i32 : i32
    %1 = arith.extui %0 : i1 to i32
    %c0_i32_0 = arith.constant 0 : i32
    %2 = arith.cmpi ne, %1, %c0_i32_0 : i32
    scf.if %2 {
      %cst_24 = arith.constant 0.000000e+00 : f32
      %36 = vector.broadcast %cst_24 : f32 to vector<4x1xf32>
      %c0_25 = arith.constant 0 : index
      %c0_26 = arith.constant 0 : index
      %37 = vector.load %arg5[%c0_25, %c0_26] : memref<4x1xf32, #tpu.memory_space<vmem>>, vector<4x1xf32>
      tpu.vector_store %arg5[%c0_25, %c0_26], %36 {strides = array<i32>} : memref<4x1xf32, #tpu.memory_space<vmem>>, vector<4x1xf32>,
      %cst_27 = arith.constant 0.000000e+00 : f32
      %38 = vector.broadcast %cst_27 : f32 to vector<4x1xf32>
      %c0_28 = arith.constant 0 : index
      %c0_29 = arith.constant 0 : index
      %39 = vector.load %arg6[%c0_28, %c0_29] : memref<4x1xf32, #tpu.memory_space<vmem>>, vector<4x1xf32>
      tpu.vector_store %arg6[%c0_28, %c0_29], %38 {strides = array<i32>} : memref<4x1xf32, #tpu.memory_space<vmem>>, vector<4x1xf32>,
      %cst_30 = arith.constant 0.000000e+00 : f32
      %40 = vector.broadcast %cst_30 : f32 to vector<4x1xf32>
      %c0_31 = arith.constant 0 : index
      %c0_32 = arith.constant 0 : index
      %41 = vector.load %arg7[%c0_31, %c0_32] : memref<4x1xf32, #tpu.memory_space<vmem>>, vector<4x1xf32>
      tpu.vector_store %arg7[%c0_31, %c0_32], %40 {strides = array<i32>} : memref<4x1xf32, #tpu.memory_space<vmem>>, vector<4x1xf32>,
    } else {
    }
    %c0 = arith.constant 0 : index
    %c0_1 = arith.constant 0 : index
    %c0_2 = arith.constant 0 : index
    %3 = vector.load %arg2[%c0, %c0_1, %c0_2] : memref<1x4x256xf32, #tpu.memory_space<vmem>>, vector<1x4x256xf32>
    %4 = vector.shape_cast %3 : vector<1x4x256xf32> to vector<4x256xf32>
    %c0_3 = arith.constant 0 : index
    %c0_4 = arith.constant 0 : index
    %c0_5 = arith.constant 0 : index
    %5 = vector.load %arg3[%c0_3, %c0_4, %c0_5] : memref<1x4x256xf32, #tpu.memory_space<vmem>>, vector<1x4x256xf32>
    %6 = vector.shape_cast %5 : vector<1x4x256xf32> to vector<4x256xf32>
    %cst = arith.constant dense<0xFF800000> : vector<256xf32>
    %7 = vector.multi_reduction <maximumf>, %4, %cst [0] : vector<4x256xf32> to vector<256xf32>
    %8 = vector.shape_cast %7 : vector<256xf32> to vector<1x256xf32>
    %9 = vector.broadcast %8 : vector<1x256xf32> to vector<4x256xf32>
    %10 = arith.subf %4, %9 : vector<4x256xf32>
    %11 = math.exp %10 : vector<4x256xf32>
    %cst_6 = arith.constant dense<0.000000e+00> : vector<256xf32>
    %12 = vector.multi_reduction <add>, %11, %cst_6 [0] : vector<4x256xf32> to vector<256xf32>
    %13 = vector.shape_cast %12 : vector<256xf32> to vector<1x256xf32>
    %14 = tpu.reciprocal %13 : vector<1x256xf32> -> vector<1x256xf32>
    %15 = vector.broadcast %14 : vector<1x256xf32> to vector<4x256xf32>
    %16 = arith.mulf %11, %15 : vector<4x256xf32>
    %c0_7 = arith.constant 0 : index
    %c0_8 = arith.constant 0 : index
    %17 = vector.load %arg5[%c0_7, %c0_8] : memref<4x1xf32, #tpu.memory_space<vmem>>, vector<4x1xf32>
    %18 = arith.mulf %16, %6 : vector<4x256xf32>
    %cst_9 = arith.constant dense<0.000000e+00> : vector<4xf32>
    %19 = vector.multi_reduction <add>, %18, %cst_9 [1] : vector<4x256xf32> to vector<4xf32>
    %20 = vector.shape_cast %19 : vector<4xf32> to vector<4x1xf32>
    %21 = arith.addf %17, %20 : vector<4x1xf32>
    %c0_10 = arith.constant 0 : index
    %c0_11 = arith.constant 0 : index
    %22 = vector.load %arg5[%c0_10, %c0_11] : memref<4x1xf32, #tpu.memory_space<vmem>>, vector<4x1xf32>
    tpu.vector_store %arg5[%c0_10, %c0_11], %21 {strides = array<i32>} : memref<4x1xf32, #tpu.memory_space<vmem>>, vector<4x1xf32>,
    %c0_12 = arith.constant 0 : index
    %c0_13 = arith.constant 0 : index
    %23 = vector.load %arg6[%c0_12, %c0_13] : memref<4x1xf32, #tpu.memory_space<vmem>>, vector<4x1xf32>
    %cst_14 = arith.constant dense<0.000000e+00> : vector<4xf32>
    %24 = vector.multi_reduction <add>, %16, %cst_14 [1] : vector<4x256xf32> to vector<4xf32>
    %25 = vector.shape_cast %24 : vector<4xf32> to vector<4x1xf32>
    %26 = arith.addf %23, %25 : vector<4x1xf32>
    %c0_15 = arith.constant 0 : index
    %c0_16 = arith.constant 0 : index
    %27 = vector.load %arg6[%c0_15, %c0_16] : memref<4x1xf32, #tpu.memory_space<vmem>>, vector<4x1xf32>
    tpu.vector_store %arg6[%c0_15, %c0_16], %26 {strides = array<i32>} : memref<4x1xf32, #tpu.memory_space<vmem>>, vector<4x1xf32>,
    %c0_17 = arith.constant 0 : index
    %c0_18 = arith.constant 0 : index
    %28 = vector.load %arg7[%c0_17, %c0_18] : memref<4x1xf32, #tpu.memory_space<vmem>>, vector<4x1xf32>
    %cst_19 = arith.constant dense<0.000000e+00> : vector<4xf32>
    %29 = vector.multi_reduction <add>, %6, %cst_19 [1] : vector<4x256xf32> to vector<4xf32>
    %30 = vector.shape_cast %29 : vector<4xf32> to vector<4x1xf32>
    %31 = arith.addf %28, %30 : vector<4x1xf32>
    %c0_20 = arith.constant 0 : index
    %c0_21 = arith.constant 0 : index
    %32 = vector.load %arg7[%c0_20, %c0_21] : memref<4x1xf32, #tpu.memory_space<vmem>>, vector<4x1xf32>
    tpu.vector_store %arg7[%c0_20, %c0_21], %31 {strides = array<i32>} : memref<4x1xf32, #tpu.memory_space<vmem>>, vector<4x1xf32>,
    %c0_i32_22 = arith.constant 0 : i32
    %33 = arith.cmpi eq, %arg1, %c0_i32_22 : i32
    %34 = arith.extui %33 : i1 to i32
    %c0_i32_23 = arith.constant 0 : i32
    %35 = arith.cmpi ne, %34, %c0_i32_23 : i32
    scf.if %35 {
      %c0_24 = arith.constant 0 : index
      %c0_25 = arith.constant 0 : index
      %36 = vector.load %arg5[%c0_24, %c0_25] : memref<4x1xf32, #tpu.memory_space<vmem>>, vector<4x1xf32>
      %c0_26 = arith.constant 0 : index
      %c0_27 = arith.constant 0 : index
      %37 = vector.load %arg6[%c0_26, %c0_27] : memref<4x1xf32, #tpu.memory_space<vmem>>, vector<4x1xf32>
      %c0_28 = arith.constant 0 : index
      %c0_29 = arith.constant 0 : index
      %38 = vector.load %arg7[%c0_28, %c0_29] : memref<4x1xf32, #tpu.memory_space<vmem>>, vector<4x1xf32>
      %39 = arith.addf %37, %38 : vector<4x1xf32>
      %cst_30 = arith.constant 2.000000e+00 : f32
      %40 = vector.broadcast %cst_30 : f32 to vector<4x1xf32>
      %41 = arith.mulf %40, %36 : vector<4x1xf32>
      %cst_31 = arith.constant 9.99999997E-7 : f32
      %42 = vector.broadcast %cst_31 : f32 to vector<4x1xf32>
      %43 = arith.addf %41, %42 : vector<4x1xf32>
      %cst_32 = arith.constant 9.99999997E-7 : f32
      %44 = vector.broadcast %cst_32 : f32 to vector<4x1xf32>
      %45 = arith.addf %39, %44 : vector<4x1xf32>
      %46 = arith.divf %43, %45 : vector<4x1xf32>
      %c0_33 = arith.constant 0 : index
      %c0_34 = arith.constant 0 : index
      %c0_35 = arith.constant 0 : index
      %47 = vector.load %arg4[%c0_33, %c0_34, %c0_35] : memref<1x4x1xf32, #tpu.memory_space<vmem>>, vector<1x4x1xf32>
      %48 = vector.shape_cast %47 : vector<1x4x1xf32> to vector<4x1xf32>
      %49 = vector.shape_cast %46 : vector<4x1xf32> to vector<1x4x1xf32>
      tpu.vector_store %arg4[%c0_33, %c0_34, %c0_35], %49 {strides = array<i32>} : memref<1x4x1xf32, #tpu.memory_space<vmem>>, vector<1x4x1xf32>,
    } else {
    }
    return
  }
  func.func @transform_0(%arg0: i32, %arg1: i32) -> (i32, i32, i32) {
    %c0_i32 = arith.constant 0 : i32
    %c0_i32_0 = arith.constant 0 : i32
    return %arg0, %c0_i32, %arg1 : i32, i32, i32
  }
  func.func @transform_1(%arg0: i32, %arg1: i32) -> (i32, i32, i32) {
    %c0_i32 = arith.constant 0 : i32
    %c0_i32_0 = arith.constant 0 : i32
    return %arg0, %c0_i32, %arg1 : i32, i32, i32
  }
  func.func @transform_2(%arg0: i32, %arg1: i32) -> (i32, i32, i32) {
    %c0_i32 = arith.constant 0 : i32
    %c0_i32_0 = arith.constant 0 : i32
    %c0_i32_1 = arith.constant 0 : i32
    return %arg0, %c0_i32, %c0_i32_0 : i32, i32, i32
  }
}

</mosaic_0001>

<bundles_post_ra>
// kernel: tpu_custom_call.1
= control target key start
LH: loop header
LB: loop body
LE: loop exit
PB: predicated region body
PF: predicated region fallthrough
CT: control target
= control target key end

     0   :  { %7 = vsyncpa [#allocation6], 0  ;;  %s844_s0 = inlined_call_operand.hbm [shape: f32[2,4,256], index: 0, kind: input, shape index: {}]   ;;  %s845_s1 = inlined_call_operand.hbm [shape: f32[2,4,256], index: 1, kind: input, shape index: {}]   ;;  %s846_s2 = inlined_call_operand.vmem [shape: f32[2,4,1], index: 2, kind: output, shape index: {}]  }
   0x1   :  { %9 = vsyncpa [#allocation6 + $0x1], 0 }
   0x2   :  { %10 = vsyncpa [#allocation8], 0 }
   0x3   :  { %12 = vsyncpa [#allocation8 + $0x1], 0  ;;  %s652_s9 = smov 0   ;;  %s654_s10 = smov 0  }
   0x4   :  { %s656_s11 = smov 0   ;;  %s658_s12 = smov 0  }
   0x5   :  { %s660_s13 = smov 0   ;;  %s662_s14 = smov 0  }
   0x6 LB: > { %s429_s15 = sadd.s32 4294967295, %s632_s14   ;;  %s30_s16 = sadd.s32 1, %s628_s13  ;;  %s632_s14 = sphi %s662_s14, %s18_s14   ;;  %s628_s13 = sphi %s660_s13, %s860_s13   ;;  %s624_s12 = sphi %s658_s12, %s859_s12   ;;  %s620_s11 = sphi %s656_s11, %s858_s11   ;;  %s616_s10 = sphi %s654_s10, %s857_s10   ;;  %s612_s9 = sphi %s652_s9, %s856_s9  }
   0x7   : > { %p32_p0 = scmp.ge.s32.totalorder %s30_s16, 2  ;;  %s39_s17 = sadd.s32 1, %s620_s11 }
   0x8   : > { %p46_p1 = scmp.ne.s32.totalorder %s620_s11, %s616_s10  ;;  %p47_p2 = scmp.eq.s32.totalorder %s632_s14, 0 }
   0x9   : > { %s862_s16 = smov (%p32_p0, %s30_s16), 0  ;;  %p52_p4 = scmp.ne.s32.totalorder %s616_s10, %s612_s9 }
   0xa   : > { %p688_p3 = por %p47_p2, %p46_p1  ;;  %s34_s19 = ssub.s32 %s628_s13, %s862_s16 }
   0xb   : > { %p53_p5 = scmp.eq.s32.totalorder %s429_s15, 0  ;;  %p37_p6 = scmp.eq.s32.totalorder %s34_s19, 0 }
   0xc   : > { %p458_p8 = scmp.lt.s32.totalorder %s632_s14, 2  ;;  %s704_s22 = sand.u32 1, %s620_s11  }
   0xd   : > { %p695_p7 = por %p53_p5, %p52_p4  ;;  %s445_s23 = sshll.u32 %s628_s13, 7 }
   0xe   : > { %s701_s21 = scalar_select %p37_p6, %s620_s11, %s39_s17  }
   0xf   : > { %s849_s20 = scalar_select %p695_p7, 1, 0 }
  0x10   : > { %s433_s24 = sshll.u32 %s704_s22, 3  ;;  %s713_s27 = scalar_lea.hbm %s844_s0, %s445_s23 }
  0x11   : > { %s134_s28 = scalar_lea.vmem [#allocation5], %s433_s24  ;;  %p719_p9 = pnand %p458_p8, %p688_p3 }
  0x12   : > { %s144_s29 = sshll.u32 %s134_s28, 4  ;;  %s131_s3 = scalar_lea.sflag [#allocation6], %s704_s22  ;;  %s723_s29 = int_to_ptr.vmem [resolvable:$true] %s144_s29 }
  0x13   : > { %s518_s4 = scalar_lea.hbm %s713_s27, 128  ;;  %p520_p13 = pneg %p719_p9 }
  0x14   : > { %p519_p12 = scmp.ne.s32.totalorder %s713_s27, %s518_s4  ;;  %s523_s7 = scalar_lea.hbm %s844_s0, 256 }
  0x15   : > { %p524_p2 = scmp.lt.u32.totalorder %s713_s27, %s844_s0  ;;  %p525_p3 = scmp.lt.u32.totalorder %s523_s7, %s518_s4 }
  0x16   : > { %p521_p0 = pnand %p520_p13, %p519_p12  ;;  %p527_p5 = scmp.lt.u32.totalorder %s518_s4, %s713_s27 }
  0x17   : > { %p526_p4 = por %p525_p3, %p524_p2 }
  0x18   : > { %p522_p1 = pneg %p521_p0 }
  0x19   : > { %p528_p6 = por %p527_p5, %p526_p4 }
  0x1b   : > { %p529_p8 = pnand %p528_p6, %p522_p1 }
  0x1d   : > { %532 = shalt.err (!%p529_p8)
}
  0x1e   : > { %s533_s15 = scalar_lea.vmem %s723_s29, 128  ;;  %s634_s17 = smov [#allocation5]  }
  0x1f   : > { %p534_p12 = scmp.ne.s32.totalorder %s723_s29, %s533_s15  ;;  %s538_s18 = sshll.u32 %s634_s17, 4  ;;  %s539_s18 = int_to_ptr.vmem [resolvable:$false] %s538_s18 }
  0x20   : > { %s540_s19 = scalar_lea.vmem %s539_s18, 256  ;;  %p541_p11 = scmp.lt.s32.totalorder %s723_s29, %s539_s18 }
  0x21   : > { %p536_p0 = pnand %p534_p12, %p520_p13  ;;  %p542_p2 = scmp.lt.s32.totalorder %s540_s19, %s533_s15 }
  0x23   : > { %p537_p10 = pneg %p536_p0  ;;  %p543_p3 = por %p542_p2, %p541_p11 }
  0x25   : > { %p544_p4 = pnand %p543_p3, %p537_p10 }
  0x27   : > { %547 = shalt.err (!%p544_p4)
}
  0x28   : > { %454 = dma.hbm_to_vmem [thread:$0]  (!%p719_p9), %s713_s27, 128, %s723_s29, %s131_s3  }
  0x29   : > { %p851_p1 = scmp.lt.s32.totalorder %s632_s14, 3  ;;  %p852_p5 = scmp.ge.s32.totalorder %s632_s14, 1 }
  0x2a   : > { %s766_s4 = scalar_lea.hbm %s845_s1, %s445_s23  ;;  %s155_s5 = scalar_lea.vmem [#allocation7], %s433_s24 }
  0x2b   : > { %p757_p6 = pnand %p852_p5, %p851_p1  ;;  %s165_s6 = sshll.u32 %s155_s5, 4  ;;  %s166_s6 = int_to_ptr.vmem [resolvable:$true] %s165_s6 }
  0x2c   : > { %s152_s27 = scalar_lea.sflag [#allocation8], %s704_s22  ;;  %s548_s29 = scalar_lea.hbm %s766_s4, 128 }
  0x2d   : > { %s853_s25 = scalar_select %p757_p6, 1, 0 }
  0x2e   : > { %p549_p10 = scmp.ne.s32.totalorder %s766_s4, %s548_s29  ;;  %s553_s23 = scalar_lea.hbm %s845_s1, 256 }
  0x2f   : > { %p554_p12 = scmp.lt.u32.totalorder %s766_s4, %s845_s1  ;;  %p555_p0 = scmp.lt.u32.totalorder %s553_s23, %s548_s29 }
  0x30   : > { %p551_p11 = pnand %p549_p10, %p520_p13  ;;  %p557_p3 = scmp.lt.u32.totalorder %s548_s29, %s766_s4 }
  0x31   : > { %p556_p2 = por %p555_p0, %p554_p12 }
  0x32   : > { %p552_p8 = pneg %p551_p11 }
  0x33   : > { %p558_p4 = por %p557_p3, %p556_p2 }
  0x35   : > { %p559_p1 = pnand %p558_p4, %p552_p8 }
  0x37   : > { %562 = shalt.err (!%p559_p1)
}
  0x38   : > { %s563_s22 = scalar_lea.vmem %s166_s6, 128  ;;  %s635_s24 = smov [#allocation7]  }
  0x39   : > { %p564_p5 = scmp.ne.s32.totalorder %s166_s6, %s563_s22  ;;  %s568_s15 = sshll.u32 %s635_s24, 4  ;;  %s569_s15 = int_to_ptr.vmem [resolvable:$false] %s568_s15 }
  0x3a   : > { %s570_s17 = scalar_lea.vmem %s569_s15, 256  ;;  %p571_p7 = scmp.lt.s32.totalorder %s166_s6, %s569_s15 }
  0x3b   : > { %p566_p10 = pnand %p564_p5, %p520_p13  ;;  %p572_p6 = scmp.lt.s32.totalorder %s570_s17, %s563_s22 }
  0x3d   : > { %p567_p11 = pneg %p566_p10  ;;  %p573_p0 = por %p572_p6, %p571_p7 }
  0x3f   : > { %p574_p12 = pnand %p573_p0, %p567_p11 }
  0x41   : > { %577 = shalt.err (!%p574_p12)
}
  0x42   : > { %457 = dma.hbm_to_vmem [thread:$0]  (!%p719_p9), %s766_s4, 128, %s166_s6, %s152_s27  }
  0x43   : > { %p854_p8 = scmp.ne.s32.totalorder %s853_s25, 0 }
  0x44   : > { %s176_s18 = sand.u32 (!%p854_p8), 1, %s616_s10   ;;  %p855_p13 = scmp.ne.s32.totalorder (!%p854_p8), %s849_s20, 0 }
  0x45   : > { %174 = sbr.rel (%p854_p8) target bundleno = 321 (0x141), region = 28  ;;  %s440_s19 = sshll.u32 (!%p854_p8), %s176_s18, 3 }
  0x46   : > { %s177_s26 = scalar_lea.sflag (!%p854_p8), [#allocation6], %s176_s18  ;;  %s180_s28 = scalar_lea.vmem (!%p854_p8), [#allocation5], %s440_s19 }
  0x4c   : > { %603 = dma.done.wait (%p855_p13), %s177_s26, 128  }
  0x4d   : > { %605 = vsyncadd (%p855_p13), %s177_s26, 4294967168  ;;  %s186_s5 = scalar_lea.sflag [#allocation8], %s176_s18  ;;  %s797_s29 = scalar_lea.vmem [#allocation7], %s440_s19 }
  0x4e   : > { %607 = dma.done.wait (%p855_p13), %s186_s5, 128  }
  0x4f   : > { %609 = vsyncadd (%p855_p13), %s186_s5, 4294967168  ;;  %vm224_vm0 = vcmask 3072   ;;  %v636_v0 = vmov 0.0   ;;  %vm233_vm1 = vcmask 1043456   ;;  %v228_v1 = vld [vmem:[%s180_s28] sm:$0xff]  ;;  %v229_v38 = vld [vmem:[%s797_s29] sm:$0xff] }
  0x50   : > { %226 = vst.msk [vmem:[#allocation3] sm:$0xf] %vm224_vm0, %v636_v0  ;;  %225 = vst.msk [vmem:[#allocation2] sm:$0xf] %vm224_vm0, %v636_v0  ;;  %v231_v2 = vcombine.high %v228_v1, %v228_v1  ;;  %v234_v3 = vsel %vm233_vm1, %v228_v1, -inf  ;;  %v305_v41 = vcombine.high %v229_v38, %v229_v38  ;;  %v307_v45 = vsel %vm233_vm1, %v229_v38, 0.0 }
  0x51   : > { %227 = vst.msk [vmem:[#allocation4] sm:$0xf] %vm224_vm0, %v636_v0  ;;  %v235_v4 = vrot.slane %v234_v3, 4  ;;  %p216_p7 = scmp.lt.s32.totalorder %s624_s12, 1 }
  0x52   : > { %v241_v5 = vsel %vm233_vm1, %v231_v2, -inf  ;;  %v308_v47 = vsel %vm233_vm1, %v305_v41, 0.0 }
  0x53   : > { %v236_v6 = vmax.f32 %v234_v3, %v235_v4  ;;  %v242_v7 = vrot.slane %v241_v5, 4  ;;  %v309_v52 = vadd.f32 %v308_v47, %v307_v45  ;;  %s864_s12 = smov (!%p216_p7, %s624_s12), 1 }
  0x54   : > { %s442_s20 = sshll.u32 %s864_s12, 2 }
  0x55   : > { %v237_v8 = vrot.slane %v236_v6, 2  ;;  %v243_v9 = vmax.f32 %v241_v5, %v242_v7  ;;  %s219_s4 = scalar_lea.vmem %s846_s2, %s442_s20 }
  0x57   : > { %v238_v10 = vmax.f32 %v236_v6, %v237_v8  ;;  %v244_v11 = vrot.slane %v243_v9, 2  ;;  %v292_v54 = vld [vmem:[#allocation3] sm:$0xf]  ;;  %v279_v56 = vld [vmem:[#allocation2] sm:$0xf] }
  0x58   : > { %v303_v58 = vld [vmem:[#allocation4] sm:$0xf] }
  0x59   : > { %v239_v12 = vrot.slane %v238_v10, 1  ;;  %v245_v13 = vmax.f32 %v243_v9, %v244_v11 }
  0x5b   : > { %v240_v14 = vmax.f32 %v238_v10, %v239_v12  ;;  %v246_v15 = vrot.slane %v245_v13, 1 }
  0x5d   : > { %v247_v16 = vmax.f32 %v245_v13, %v246_v15 }
  0x5f   : > { %v250_v17 = vcombine.low %v240_v14, %v247_v16 }
  0x61   : > { %v252_v18 = vsub.f32 %v228_v1, %v250_v17 }
  0x63   : > { %v253_v19 = vmul.f32 1.442695, %v252_v18 }
  0x65   : > { %510 = vpow2.f32 %v253_v19 }
  0x6f   : > { %v511_v20 = vpop.eup %510 }
  0x70   : > { %v256_v21 = vcombine.high %v511_v20, %v511_v20  ;;  %v258_v22 = vsel %vm233_vm1, %v511_v20, 0.0 }
  0x71   : > { %v259_v23 = vrot.slane %v258_v22, 4 }
  0x72   : > { %v265_v24 = vsel %vm233_vm1, %v256_v21, 0.0 }
  0x73   : > { %v260_v25 = vadd.f32 %v259_v23, %v258_v22  ;;  %v266_v26 = vrot.slane %v265_v24, 4 }
  0x75   : > { %v261_v27 = vrot.slane %v260_v25, 2  ;;  %v267_v28 = vadd.f32 %v266_v26, %v265_v24 }
  0x77   : > { %v262_v29 = vadd.f32 %v261_v27, %v260_v25  ;;  %v268_v30 = vrot.slane %v267_v28, 2 }
  0x79   : > { %v263_v31 = vrot.slane %v262_v29, 1  ;;  %v269_v32 = vadd.f32 %v268_v30, %v267_v28 }
  0x7b   : > { %v264_v33 = vadd.f32 %v263_v31, %v262_v29  ;;  %v270_v34 = vrot.slane %v269_v32, 1 }
  0x7d   : > { %v271_v35 = vadd.f32 %v270_v34, %v269_v32  ;;  %512 = vrcp.f32 %v264_v33 }
  0x7f   : > { %514 = vrcp.f32 %v271_v35 }
  0x87   : > { %v513_v36 = vpop.eup %512 }
  0x89   : > { %v515_v37 = vpop.eup %514 }
  0x8a   : > { %v276_v39 = vcombine.low %v513_v36, %v515_v37 }
  0x8c   : > { %v278_v40 = vmul.f32 %v511_v20, %v276_v39 }
  0x8e   : > { %v294_v42 = vcombine.high %v278_v40, %v278_v40  ;;  %v296_v43 = vsel %vm233_vm1, %v278_v40, 0.0  ;;  %v280_v44 = vmul.f32 %v278_v40, %v229_v38 }
  0x90   : > { %v297_v46 = vsel %vm233_vm1, %v294_v42, 0.0  ;;  %v282_v48 = vcombine.high %v280_v44, %v280_v44  ;;  %v284_v49 = vsel %vm233_vm1, %v280_v44, 0.0 }
  0x91   : > { %v298_v50 = vadd.f32 %v297_v46, %v296_v43 }
  0x92   : > { %v285_v51 = vsel %vm233_vm1, %v282_v48, 0.0 }
  0x93   : > { %299 = vadd.xlane.f32.xlu0 %v298_v50  ;;  %v286_v53 = vadd.f32 %v285_v51, %v284_v49 }
  0x95   : > { %287 = vadd.xlane.f32.xlu1 %v286_v53 }
  0x97   : > { %310 = vadd.xlane.f32.xlu0 %v309_v52 }
 0x120   : > { %v300_v55 = vpop.xlane.xlu0 %299 }
 0x121   : > { %v301_v57 = vadd.f32 %v300_v55, %v292_v54 }
 0x122   : > { %v288_v59 = vpop.xlane.xlu1 %287 }
 0x123   : > { %302 = vst.msk [vmem:[#allocation3] sm:$0xf] %vm224_vm0, %v301_v57  ;;  %v289_v60 = vadd.f32 %v288_v59, %v279_v56 }
 0x124   : > { %v311_v61 = vpop.xlane.xlu0 %310 }
 0x125   : > { %v312_v62 = vadd.f32 %v311_v61, %v303_v58  ;;  %291 = vst.msk [vmem:[#allocation2] sm:$0xf] %vm224_vm0, %v289_v60 }
 0x127   : > { %313 = vst.msk [vmem:[#allocation4] sm:$0xf] %vm224_vm0, %v312_v62 }
 0x12a   : > { %v318_v63 = vld [vmem:[#allocation3] sm:$0xf] }
 0x12c   : > { %v317_v3 = vld [vmem:[#allocation2] sm:$0xf] }
 0x12d   : > { %v321_v4 = vmul.f32 2.0, %v317_v3 }
 0x12e   : > { %v319_v0 = vld [vmem:[#allocation4] sm:$0xf] }
 0x12f   : > { %v320_v1 = vadd.f32 %v319_v0, %v318_v63  ;;  %v322_v5 = vadd.f32 1e-06, %v321_v4 }
 0x131   : > { %v323_v2 = vadd.f32 1e-06, %v320_v1 }
 0x133   : > { %516 = vrcp.f32 %v323_v2 }
 0x13d   : > { %v517_v6 = vpop.eup %516 }
 0x13e   : > { %v325_v7 = vmul.f32 %v517_v6, %v322_v5 }
 0x140   : > { %326 = vst.msk [vmem:[%s219_s4] sm:$0xf] %vm224_vm0, %v325_v7 }
 0x141 PF: > { %s18_s14 = sadd.s32 1, %s632_s14   ;;  %s856_s9 = smov %s616_s10 }
 0x142   : > { %p15_p9 = scmp.ge.s32.totalorder %s18_s14, 4   ;;  %s857_s10 = smov %s620_s11 }
 0x143   : > { %s858_s11 = smov %s701_s21  ;;  %s859_s12 = smov %s628_s13 }
 0x144   : > { %s860_s13 = smov %s862_s16  ;;  %17 = sbr.rel (!%p15_p9) target bundleno = 6 (0x6), region = 89 }
 0x14b   :  { %346 = vsyncpa [#allocation6], 1 }
 0x14c   :  { %348 = vsyncpa [#allocation6 + $0x1], 1 }
 0x14d   :  { %349 = vsyncpa [#allocation8], 1 }
 0x14e   :  { %351 = vsyncpa [#allocation8 + $0x1], 1 }

</bundles_post_ra>
